<compile_context>
chip_gen: v6e
topology: v6e:2x2x1
jax: 0.10.0
libtpu: 0.0.40
codegen_flags: <defaults>
</compile_context>

<pallas_src>
import functools
import math

import jax
import jax.numpy as jnp
from jax import lax
from jax.experimental import pallas as pl
from jax.experimental.pallas import tpu as pltpu


# ------------------------------- kernel --------------------------------------

def sage_kernel(x_ref, adj_ref, w0_ref, w1_ref, bias_ref, bn_ref, out_ref):
    B, N, Cin = x_ref.shape
    H = w0_ref.shape[1]
    Cout = w1_ref.shape[1]

    # Adjacency stays bf16 (MXU consumes it in bf16 anyway); degree row-sums
    # accumulate in f32 and the 1/deg factor stays in f32 via the EUP.
    adj = adj_ref[...]                                                 # bf16 [B,N,N]
    deg = jnp.sum(adj, axis=-1, keepdims=True, dtype=jnp.float32)      # f32  [B,N,1]
    inv_deg = pl.reciprocal(jnp.maximum(deg, 1.0), approx=True)        # f32  [B,N,1]

    bias = bias_ref[...]                                               # (2, 128) f32
    bn = bn_ref[...]                                                   # (N, 4)   f32

    def sage_bn_layer(h3, w_ref, b_row, g_col, t_col, c_in, c_out):
        # ---- DenseSAGEConv (normalize=False), rel/root fused into one dot ----
        h16 = h3.astype(jnp.bfloat16)                                  # [B,N,c_in]
        agg = jnp.einsum('bnm,bmc->bnc', adj, h16,
                         preferred_element_type=jnp.float32) * inv_deg  # mean agg, f32
        feat = jnp.concatenate([agg.astype(jnp.bfloat16), h16], axis=-1)  # [B,N,2c_in]
        w = w_ref[...].astype(jnp.bfloat16)                            # [2c_in, c_out]
        out = jnp.dot(feat.reshape(B * N, 2 * c_in), w,
                      preferred_element_type=jnp.float32).reshape(B, N, c_out)
        out = out + bias[b_row:b_row + 1, :c_out][None]                # (1,1,c_out)
        # ---- ReLU ----
        out = jnp.maximum(out, 0.0)
        # ---- BatchNorm1d(num_nodes), training-mode stats, one pass ----
        inv_cnt = 1.0 / float(B * c_out)
        mean = jnp.sum(out, axis=(0, 2), keepdims=True) * inv_cnt      # [1,N,1]
        ex2 = jnp.sum(out * out, axis=(0, 2), keepdims=True) * inv_cnt # [1,N,1]
        var = jnp.maximum(ex2 - mean * mean, 0.0)
        gamma = bn[:, g_col:g_col + 1][None]                           # (1,N,1)
        beta = bn[:, t_col:t_col + 1][None]                            # (1,N,1)
        return (out - mean) * lax.rsqrt(var + 1e-5) * gamma + beta

    h = sage_bn_layer(x_ref[...], w0_ref, b_row=0, g_col=0, t_col=1,
                      c_in=Cin, c_out=H)
    h = sage_bn_layer(h, w1_ref, b_row=1, g_col=2, t_col=3,
                      c_in=H, c_out=Cout)

    out_ref[...] = h.astype(out_ref.dtype)


# ------------------------------ wrappers --------------------------------------

def _zero_index(nd, i):
    return (0,) * nd


def _full_spec(a):
    return pl.BlockSpec(a.shape, functools.partial(_zero_index, a.ndim))


def sage_forward(x, adj, params):
    B, N, Cin = x.shape
    H = params['w0'].shape[1]
    Cout = params['w1'].shape[1]
    assert H <= 128 and Cout <= 128, "bias slab packing assumes <=128 features"

    # Adjacency shipped per-graph in bf16: the largest input, halved DMA bytes,
    # no block-diagonal blow-up.
    adj_bf16 = adj.astype(jnp.bfloat16)

    # Packed lane-dense parameter slabs (few inputs instead of many tiny DMAs).
    bias_slab = jnp.zeros((2, 128), jnp.float32)
    bias_slab = bias_slab.at[0, :H].set(params['b0'])
    bias_slab = bias_slab.at[1, :Cout].set(params['b1'])
    bn_slab = jnp.stack([params['g0'], params['t0'],
                         params['g1'], params['t1']], axis=1)           # (N, 4)

    args = (x, adj_bf16, params['w0'], params['w1'], bias_slab, bn_slab)

    flops = (2 * B * N * N * Cin + 2 * B * N * (2 * Cin) * H        # layer 1
             + 2 * B * N * N * H + 2 * B * N * (2 * H) * Cout)      # layer 2
    bytes_accessed = (x.size * 4 + adj_bf16.size * 2
                      + params['w0'].size * 4 + params['w1'].size * 4
                      + bias_slab.size * 4 + bn_slab.size * 4
                      + B * N * Cout * 4)

    out = pl.pallas_call(
        sage_kernel,
        grid=(1,),
        in_specs=[_full_spec(a) for a in args],
        out_specs=pl.BlockSpec((B, N, Cout), functools.partial(_zero_index, 3)),
        out_shape=jax.ShapeDtypeStruct((B, N, Cout), jnp.float32),
        compiler_params=pltpu.CompilerParams(
            dimension_semantics=("arbitrary",),
            vmem_limit_bytes=32 * 1024 * 1024),
        cost_estimate=pl.CostEstimate(flops=flops,
                                      transcendentals=B * N + 2 * N,
                                      bytes_accessed=bytes_accessed),
    )(*args)
    return out


# --------------------------- parameter construction ---------------------------

def init_params(key, in_channels, hidden, out_channels, num_nodes):
    ks = jax.random.split(key, 6)

    def lin_w(k, cin, cout):
        bound = 1.0 / math.sqrt(cin)
        return jax.random.uniform(k, (cin, cout), jnp.float32, -bound, bound)

    # per-layer weights stacked along the contraction axis: [W_rel ; W_root]
    w0 = jnp.concatenate([lin_w(ks[0], in_channels, hidden),
                          lin_w(ks[1], in_channels, hidden)], axis=0)   # [2*Cin, H]
    w1 = jnp.concatenate([lin_w(ks[2], hidden, out_channels),
                          lin_w(ks[3], hidden, out_channels)], axis=0)  # [2*H, Cout]
    b0 = jax.random.uniform(ks[4], (hidden,), jnp.float32,
                            -1.0 / math.sqrt(in_channels), 1.0 / math.sqrt(in_channels))
    b1 = jax.random.uniform(ks[5], (out_channels,), jnp.float32,
                            -1.0 / math.sqrt(hidden), 1.0 / math.sqrt(hidden))
    g0 = jnp.ones((num_nodes,), jnp.float32)
    t0 = jnp.zeros((num_nodes,), jnp.float32)
    g1 = jnp.ones((num_nodes,), jnp.float32)
    t1 = jnp.zeros((num_nodes,), jnp.float32)
    return dict(w0=w0, b0=b0, g0=g0, t0=t0, w1=w1, b1=b1, g1=g1, t1=t1)


# ----------------------------------- main --------------------------------------

if __name__ == "__main__":
    batch = 2
    num_nodes = 32            # norm_channels == num_nodes for BatchNorm1d
    in_channels = 32
    hidden_channels = 64
    out_channels = 64

    key = jax.random.PRNGKey(0)
    kx, ka, kp = jax.random.split(key, 3)
    x = jax.random.normal(kx, (batch, num_nodes, in_channels), jnp.float32)
    a = jax.random.uniform(ka, (batch, num_nodes, num_nodes), jnp.float32)
    adj = (a + jnp.swapaxes(a, 1, 2)) * 0.5      # symmetric dense adjacency

    params = init_params(kp, in_channels, hidden_channels, out_channels, num_nodes)

    out = sage_forward(x, adj, params)
    out = jax.block_until_ready(out)
    assert out.shape == (batch, num_nodes, out_channels)
    print("KERNEL_OK")
</pallas_src>

<mosaic_0001>
module attributes {stable_mosaic.version = 11 : i64} {
  func.func @sage_kernel(%arg0: i32, %arg1: memref<2x32x32xf32, #tpu.memory_space<vmem>>, %arg2: memref<2x32x32xbf16, #tpu.memory_space<vmem>>, %arg3: memref<64x64xf32, #tpu.memory_space<vmem>>, %arg4: memref<128x64xf32, #tpu.memory_space<vmem>>, %arg5: memref<2x128xf32, #tpu.memory_space<vmem>>, %arg6: memref<32x4xf32, #tpu.memory_space<vmem>>, %arg7: memref<2x32x64xf32, #tpu.memory_space<vmem>>) attributes {dimension_semantics = [#tpu.dimension_semantics<arbitrary>], iteration_bounds = array<i64: 1>, scalar_prefetch = 0 : i64, scratch_operands = 0 : i64, tpu.core_type = #tpu.core_type<tc>, window_params = [{pipeline_mode = #tpu.pipeline_mode<synchronous>, transform_indices = @transform_0, window_bounds = array<i64: 2, 32, 32>}, {pipeline_mode = #tpu.pipeline_mode<synchronous>, transform_indices = @transform_1, window_bounds = array<i64: 2, 32, 32>}, {pipeline_mode = #tpu.pipeline_mode<synchronous>, transform_indices = @transform_2, window_bounds = array<i64: 64, 64>}, {pipeline_mode = #tpu.pipeline_mode<synchronous>, transform_indices = @transform_3, window_bounds = array<i64: 128, 64>}, {pipeline_mode = #tpu.pipeline_mode<synchronous>, transform_indices = @transform_4, window_bounds = array<i64: 2, 128>}, {pipeline_mode = #tpu.pipeline_mode<synchronous>, transform_indices = @transform_5, window_bounds = array<i64: 32, 4>}, {pipeline_mode = #tpu.pipeline_mode<synchronous>, transform_indices = @transform_6, window_bounds = array<i64: 2, 32, 64>}]} {
    %c0 = arith.constant 0 : index
    %c0_0 = arith.constant 0 : index
    %c0_1 = arith.constant 0 : index
    %0 = vector.load %arg2[%c0, %c0_0, %c0_1] : memref<2x32x32xbf16, #tpu.memory_space<vmem>>, vector<2x32x32xbf16>
    %1 = arith.extf %0 : vector<2x32x32xbf16> to vector<2x32x32xf32>
    %cst = arith.constant dense<0.000000e+00> : vector<2x32xf32>
    %2 = vector.multi_reduction <add>, %1, %cst [2] : vector<2x32x32xf32> to vector<2x32xf32>
    %3 = vector.shape_cast %2 : vector<2x32xf32> to vector<2x32x1xf32>
    %cst_2 = arith.constant 1.000000e+00 : f32
    %4 = vector.broadcast %cst_2 : f32 to vector<2x32x1xf32>
    %5 = arith.maximumf %3, %4 : vector<2x32x1xf32>
    %6 = tpu.reciprocal %5 {approx = true} : vector<2x32x1xf32> -> vector<2x32x1xf32>
    %c0_3 = arith.constant 0 : index
    %c0_4 = arith.constant 0 : index
    %7 = vector.load %arg5[%c0_3, %c0_4] : memref<2x128xf32, #tpu.memory_space<vmem>>, vector<2x128xf32>
    %c0_5 = arith.constant 0 : index
    %c0_6 = arith.constant 0 : index
    %8 = vector.load %arg6[%c0_5, %c0_6] : memref<32x4xf32, #tpu.memory_space<vmem>>, vector<32x4xf32>
    %c0_7 = arith.constant 0 : index
    %c0_8 = arith.constant 0 : index
    %c0_9 = arith.constant 0 : index
    %9 = vector.load %arg1[%c0_7, %c0_8, %c0_9] : memref<2x32x32xf32, #tpu.memory_space<vmem>>, vector<2x32x32xf32>
    %10 = arith.truncf %9 : vector<2x32x32xf32> to vector<2x32x32xbf16>
    "tpu.trace_start"() <{level = 10 : i32, message = "bnm,bmc->bnc"}> : () -> ()
    %cst_10 = arith.constant dense<0.000000e+00> : vector<2x32x32xf32>
    %11 = tpu.matmul %0, %10, %cst_10 {dimension_numbers = #tpu.dot_dimension_numbers<[2], [1], [1], [2], [0, 0, 0, 1, 1, 2], [0], [0]>} : vector<2x32x32xbf16>, vector<2x32x32xbf16>, vector<2x32x32xf32> -> vector<2x32x32xf32>
    "tpu.trace_stop"() : () -> ()
    %12 = vector.broadcast %6 : vector<2x32x1xf32> to vector<2x32x32xf32>
    %13 = arith.mulf %11, %12 : vector<2x32x32xf32>
    %14 = arith.truncf %13 : vector<2x32x32xf32> to vector<2x32x32xbf16>
    %15 = tpu.concatenate %14, %10 in 2 : vector<2x32x32xbf16>, vector<2x32x32xbf16> -> vector<2x32x64xbf16>
    %c0_11 = arith.constant 0 : index
    %c0_12 = arith.constant 0 : index
    %16 = vector.load %arg3[%c0_11, %c0_12] : memref<64x64xf32, #tpu.memory_space<vmem>>, vector<64x64xf32>
    %17 = arith.truncf %16 : vector<64x64xf32> to vector<64x64xbf16>
    %18 = vector.shape_cast %15 : vector<2x32x64xbf16> to vector<64x64xbf16>
    %cst_13 = arith.constant dense<0.000000e+00> : vector<64x64xf32>
    %19 = tpu.matmul %18, %17, %cst_13 {dimension_numbers = #tpu.dot_dimension_numbers<[1], [0], [0], [1], [0, 0, 1, 1], [], []>} : vector<64x64xbf16>, vector<64x64xbf16>, vector<64x64xf32> -> vector<64x64xf32>
    %20 = vector.shape_cast %19 : vector<64x64xf32> to vector<2x32x64xf32>
    %21 = vector.extract_strided_slice %7 {offsets = [0, 0], sizes = [1, 64], strides = [1, 1]} : vector<2x128xf32> to vector<1x64xf32>
    %22 = vector.shape_cast %21 : vector<1x64xf32> to vector<1x1x64xf32>
    %23 = vector.broadcast %22 : vector<1x1x64xf32> to vector<2x32x64xf32>
    %24 = arith.addf %20, %23 : vector<2x32x64xf32>
    %cst_14 = arith.constant 0.000000e+00 : f32
    %25 = vector.broadcast %cst_14 : f32 to vector<2x32x64xf32>
    %26 = arith.maximumf %24, %25 : vector<2x32x64xf32>
    %cst_15 = arith.constant dense<0.000000e+00> : vector<32xf32>
    %27 = vector.multi_reduction <add>, %26, %cst_15 [0, 2] : vector<2x32x64xf32> to vector<32xf32>
    %28 = vector.shape_cast %27 : vector<32xf32> to vector<1x32x1xf32>
    %cst_16 = arith.constant 7.812500e-03 : f32
    %29 = vector.broadcast %cst_16 : f32 to vector<1x32x1xf32>
    %30 = arith.mulf %28, %29 : vector<1x32x1xf32>
    %31 = arith.mulf %26, %26 : vector<2x32x64xf32>
    %cst_17 = arith.constant dense<0.000000e+00> : vector<32xf32>
    %32 = vector.multi_reduction <add>, %31, %cst_17 [0, 2] : vector<2x32x64xf32> to vector<32xf32>
    %33 = vector.shape_cast %32 : vector<32xf32> to vector<1x32x1xf32>
    %cst_18 = arith.constant 7.812500e-03 : f32
    %34 = vector.broadcast %cst_18 : f32 to vector<1x32x1xf32>
    %35 = arith.mulf %33, %34 : vector<1x32x1xf32>
    %36 = arith.mulf %30, %30 : vector<1x32x1xf32>
    %37 = arith.subf %35, %36 : vector<1x32x1xf32>
    %cst_19 = arith.constant 0.000000e+00 : f32
    %38 = vector.broadcast %cst_19 : f32 to vector<1x32x1xf32>
    %39 = arith.maximumf %37, %38 : vector<1x32x1xf32>
    %40 = vector.extract_strided_slice %8 {offsets = [0, 0], sizes = [32, 1], strides = [1, 1]} : vector<32x4xf32> to vector<32x1xf32>
    %41 = vector.shape_cast %40 : vector<32x1xf32> to vector<1x32x1xf32>
    %42 = vector.extract_strided_slice %8 {offsets = [0, 1], sizes = [32, 1], strides = [1, 1]} : vector<32x4xf32> to vector<32x1xf32>
    %43 = vector.shape_cast %42 : vector<32x1xf32> to vector<1x32x1xf32>
    %44 = vector.broadcast %30 : vector<1x32x1xf32> to vector<2x32x64xf32>
    %45 = arith.subf %26, %44 : vector<2x32x64xf32>
    %cst_20 = arith.constant 9.99999974E-6 : f32
    %46 = vector.broadcast %cst_20 : f32 to vector<1x32x1xf32>
    %47 = arith.addf %39, %46 : vector<1x32x1xf32>
    %48 = math.rsqrt %47 : vector<1x32x1xf32>
    %49 = vector.broadcast %48 : vector<1x32x1xf32> to vector<2x32x64xf32>
    %50 = arith.mulf %45, %49 : vector<2x32x64xf32>
    %51 = vector.broadcast %41 : vector<1x32x1xf32> to vector<2x32x64xf32>
    %52 = arith.mulf %50, %51 : vector<2x32x64xf32>
    %53 = vector.broadcast %43 : vector<1x32x1xf32> to vector<2x32x64xf32>
    %54 = arith.addf %52, %53 : vector<2x32x64xf32>
    %55 = arith.truncf %54 : vector<2x32x64xf32> to vector<2x32x64xbf16>
    "tpu.trace_start"() <{level = 10 : i32, message = "bnm,bmc->bnc"}> : () -> ()
    %cst_21 = arith.constant dense<0.000000e+00> : vector<2x32x64xf32>
    %56 = tpu.matmul %0, %55, %cst_21 {dimension_numbers = #tpu.dot_dimension_numbers<[2], [1], [1], [2], [0, 0, 0, 1, 1, 2], [0], [0]>} : vector<2x32x32xbf16>, vector<2x32x64xbf16>, vector<2x32x64xf32> -> vector<2x32x64xf32>
    "tpu.trace_stop"() : () -> ()
    %57 = vector.broadcast %6 : vector<2x32x1xf32> to vector<2x32x64xf32>
    %58 = arith.mulf %56, %57 : vector<2x32x64xf32>
    %59 = arith.truncf %58 : vector<2x32x64xf32> to vector<2x32x64xbf16>
    %60 = tpu.concatenate %59, %55 in 2 : vector<2x32x64xbf16>, vector<2x32x64xbf16> -> vector<2x32x128xbf16>
    %c0_22 = arith.constant 0 : index
    %c0_23 = arith.constant 0 : index
    %61 = vector.load %arg4[%c0_22, %c0_23] : memref<128x64xf32, #tpu.memory_space<vmem>>, vector<128x64xf32>
    %62 = arith.truncf %61 : vector<128x64xf32> to vector<128x64xbf16>
    %63 = vector.shape_cast %60 : vector<2x32x128xbf16> to vector<64x128xbf16>
    %cst_24 = arith.constant dense<0.000000e+00> : vector<64x64xf32>
    %64 = tpu.matmul %63, %62, %cst_24 {dimension_numbers = #tpu.dot_dimension_numbers<[1], [0], [0], [1], [0, 0, 1, 1], [], []>} : vector<64x128xbf16>, vector<128x64xbf16>, vector<64x64xf32> -> vector<64x64xf32>
    %65 = vector.shape_cast %64 : vector<64x64xf32> to vector<2x32x64xf32>
    %66 = vector.extract_strided_slice %7 {offsets = [1, 0], sizes = [1, 64], strides = [1, 1]} : vector<2x128xf32> to vector<1x64xf32>
    %67 = vector.shape_cast %66 : vector<1x64xf32> to vector<1x1x64xf32>
    %68 = vector.broadcast %67 : vector<1x1x64xf32> to vector<2x32x64xf32>
    %69 = arith.addf %65, %68 : vector<2x32x64xf32>
    %cst_25 = arith.constant 0.000000e+00 : f32
    %70 = vector.broadcast %cst_25 : f32 to vector<2x32x64xf32>
    %71 = arith.maximumf %69, %70 : vector<2x32x64xf32>
    %cst_26 = arith.constant dense<0.000000e+00> : vector<32xf32>
    %72 = vector.multi_reduction <add>, %71, %cst_26 [0, 2] : vector<2x32x64xf32> to vector<32xf32>
    %73 = vector.shape_cast %72 : vector<32xf32> to vector<1x32x1xf32>
    %cst_27 = arith.constant 7.812500e-03 : f32
    %74 = vector.broadcast %cst_27 : f32 to vector<1x32x1xf32>
    %75 = arith.mulf %73, %74 : vector<1x32x1xf32>
    %76 = arith.mulf %71, %71 : vector<2x32x64xf32>
    %cst_28 = arith.constant dense<0.000000e+00> : vector<32xf32>
    %77 = vector.multi_reduction <add>, %76, %cst_28 [0, 2] : vector<2x32x64xf32> to vector<32xf32>
    %78 = vector.shape_cast %77 : vector<32xf32> to vector<1x32x1xf32>
    %cst_29 = arith.constant 7.812500e-03 : f32
    %79 = vector.broadcast %cst_29 : f32 to vector<1x32x1xf32>
    %80 = arith.mulf %78, %79 : vector<1x32x1xf32>
    %81 = arith.mulf %75, %75 : vector<1x32x1xf32>
    %82 = arith.subf %80, %81 : vector<1x32x1xf32>
    %cst_30 = arith.constant 0.000000e+00 : f32
    %83 = vector.broadcast %cst_30 : f32 to vector<1x32x1xf32>
    %84 = arith.maximumf %82, %83 : vector<1x32x1xf32>
    %85 = vector.extract_strided_slice %8 {offsets = [0, 2], sizes = [32, 1], strides = [1, 1]} : vector<32x4xf32> to vector<32x1xf32>
    %86 = vector.shape_cast %85 : vector<32x1xf32> to vector<1x32x1xf32>
    %87 = vector.extract_strided_slice %8 {offsets = [0, 3], sizes = [32, 1], strides = [1, 1]} : vector<32x4xf32> to vector<32x1xf32>
    %88 = vector.shape_cast %87 : vector<32x1xf32> to vector<1x32x1xf32>
    %89 = vector.broadcast %75 : vector<1x32x1xf32> to vector<2x32x64xf32>
    %90 = arith.subf %71, %89 : vector<2x32x64xf32>
    %cst_31 = arith.constant 9.99999974E-6 : f32
    %91 = vector.broadcast %cst_31 : f32 to vector<1x32x1xf32>
    %92 = arith.addf %84, %91 : vector<1x32x1xf32>
    %93 = math.rsqrt %92 : vector<1x32x1xf32>
    %94 = vector.broadcast %93 : vector<1x32x1xf32> to vector<2x32x64xf32>
    %95 = arith.mulf %90, %94 : vector<2x32x64xf32>
    %96 = vector.broadcast %86 : vector<1x32x1xf32> to vector<2x32x64xf32>
    %97 = arith.mulf %95, %96 : vector<2x32x64xf32>
    %98 = vector.broadcast %88 : vector<1x32x1xf32> to vector<2x32x64xf32>
    %99 = arith.addf %97, %98 : vector<2x32x64xf32>
    %c0_32 = arith.constant 0 : index
    %c0_33 = arith.constant 0 : index
    %c0_34 = arith.constant 0 : index
    %100 = vector.load %arg7[%c0_32, %c0_33, %c0_34] : memref<2x32x64xf32, #tpu.memory_space<vmem>>, vector<2x32x64xf32>
    tpu.vector_store %arg7[%c0_32, %c0_33, %c0_34], %99 {strides = array<i32>} : memref<2x32x64xf32, #tpu.memory_space<vmem>>, vector<2x32x64xf32>,
    return
  }
  func.func @transform_0(%arg0: i32) -> (i32, i32, i32) {
    %c0_i32 = arith.constant 0 : i32
    %c0_i32_0 = arith.constant 0 : i32
    %c0_i32_1 = arith.constant 0 : i32
    %c0_i32_2 = arith.constant 0 : i32
    return %c0_i32, %c0_i32_0, %c0_i32_1 : i32, i32, i32
  }
  func.func @transform_1(%arg0: i32) -> (i32, i32, i32) {
    %c0_i32 = arith.constant 0 : i32
    %c0_i32_0 = arith.constant 0 : i32
    %c0_i32_1 = arith.constant 0 : i32
    %c0_i32_2 = arith.constant 0 : i32
    return %c0_i32, %c0_i32_0, %c0_i32_1 : i32, i32, i32
  }
  func.func @transform_2(%arg0: i32) -> (i32, i32) {
    %c0_i32 = arith.constant 0 : i32
    %c0_i32_0 = arith.constant 0 : i32
    %c0_i32_1 = arith.constant 0 : i32
    return %c0_i32, %c0_i32_0 : i32, i32
  }
  func.func @transform_3(%arg0: i32) -> (i32, i32) {
    %c0_i32 = arith.constant 0 : i32
    %c0_i32_0 = arith.constant 0 : i32
    %c0_i32_1 = arith.constant 0 : i32
    return %c0_i32, %c0_i32_0 : i32, i32
  }
  func.func @transform_4(%arg0: i32) -> (i32, i32) {
    %c0_i32 = arith.constant 0 : i32
    %c0_i32_0 = arith.constant 0 : i32
    %c0_i32_1 = arith.constant 0 : i32
    return %c0_i32, %c0_i32_0 : i32, i32
  }
  func.func @transform_5(%arg0: i32) -> (i32, i32) {
    %c0_i32 = arith.constant 0 : i32
    %c0_i32_0 = arith.constant 0 : i32
    %c0_i32_1 = arith.constant 0 : i32
    return %c0_i32, %c0_i32_0 : i32, i32
  }
  func.func @transform_6(%arg0: i32) -> (i32, i32, i32) {
    %c0_i32 = arith.constant 0 : i32
    %c0_i32_0 = arith.constant 0 : i32
    %c0_i32_1 = arith.constant 0 : i32
    %c0_i32_2 = arith.constant 0 : i32
    return %c0_i32, %c0_i32_0, %c0_i32_1 : i32, i32, i32
  }
}

</mosaic_0001>

<bundles_post_ra>
// kernel: tpu_custom_call.1
= control target key start
LH: loop header
LB: loop body
LE: loop exit
PB: predicated region body
PF: predicated region fallthrough
CT: control target
= control target key end

     0   :  { %vm41_vm0 = vcmask 261120   ;;  %s1577_s0 = inlined_call_operand.vmem [shape: f32[2,32,32], index: 0, kind: input, shape index: {}]   ;;  %s1578_s1 = inlined_call_operand.vmem [shape: bf16[2,32,32], index: 1, kind: input, shape index: {}]   ;;  %s1579_s2 = inlined_call_operand.vmem [shape: f32[64,64], index: 2, kind: input, shape index: {}]   ;;  %s1580_s3 = inlined_call_operand.vmem [shape: f32[128,64], index: 3, kind: input, shape index: {}]   ;;  %s1581_s4 = inlined_call_operand.vmem [shape: f32[2,128], index: 4, kind: input, shape index: {}]   ;;  %s1582_s5 = inlined_call_operand.vmem [shape: f32[32,4], index: 5, kind: input, shape index: {}]   ;;  %s1583_s6 = inlined_call_operand.hbm [shape: f32[2,32,64], index: 6, kind: output, shape index: {}]  }
   0x1   :  { %v89_v0 = vld [vmem:[%s1577_s0 + $0x10] sm:$0xff]  ;;  %v90_v1 = vld [vmem:[%s1577_s0 + $0x18] sm:$0xff]  ;;  %v87_v5 = vld [vmem:[%s1577_s0] sm:$0xff] }
   0x2   :  { %v93_v2 = vld [vmem:[%s1577_s0 + $0x30] sm:$0xff]  ;;  %v96_v3 = vpack.c.bf16 %v90_v1, %v89_v0  ;;  %v94_v4 = vld [vmem:[%s1577_s0 + $0x38] sm:$0xff]  ;;  %v88_v6 = vld [vmem:[%s1577_s0 + $0x8] sm:$0xff] }
   0x3   :  { %v98_v7 = vpack.c.bf16 %v94_v4, %v93_v2  ;;  %v95_v8 = vpack.c.bf16 %v88_v6, %v87_v5  ;;  %v91_v9 = vld [vmem:[%s1577_s0 + $0x20] sm:$0xff]  ;;  %v92_v10 = vld [vmem:[%s1577_s0 + $0x28] sm:$0xff]  ;;  %v1215_v14 = vld [vmem:[%s1578_s1 + $0x10] sm:$0xff]  }
   0x4   :  { %v1205_v11 = vld [vmem:[%s1578_s1] sm:$0xff]   ;;  %982 = vmatprep.subr.bf16.mxu0 %v96_v3  ;;  %v97_v12 = vpack.c.bf16 %v92_v10, %v91_v9  ;;  %v1210_v13 = vld [vmem:[%s1578_s1 + $0x8] sm:$0xff]  }
   0x5   :  { %v33_v15 = vunpack.c.l.bf16 %v1205_v11  ;;  %983 = vmatpush3.bf16.msra.mxu0 %v96_v3  ;;  %990 = vmatprep.subr.bf16.mxu1 %v98_v7  ;;  %v35_v16 = vunpack.c.l.bf16 %v1210_v13 }
   0x6   :  { %11 = vsyncpa [#allocation3], 0  ;;  %991 = vmatpush3.bf16.msra.mxu1 %v98_v7  ;;  %984 = vmatprep.subr.bf16.mxu0 %v95_v8  ;;  %v1222_v17 = vld [vmem:[%s1578_s1 + $0x18] sm:$0xff]   ;;  %v36_v19 = vunpack.c.h.bf16 %v1210_v13  ;;  %v34_v20 = vunpack.c.h.bf16 %v1205_v11  ;;  %v38_v23 = vunpack.c.h.bf16 %v1215_v14  ;;  %v37_v25 = vunpack.c.l.bf16 %v1215_v14  ;;  %v271_v32 = vld [vmem:[%s1579_s2 + $0x30] sm:$0xff]  ;;  %s1134_s23 = smov 32  }
   0x7   :  { %v42_v18 = vsel %vm41_vm0, %v33_v15, 0.0  ;;  %992 = vmatprep.subr.bf16.mxu1 %v97_v12  ;;  %986 = vmatprep.mubr.msk.bf16.mxu0 %vm41_vm0, %v1205_v11  ;;  %v48_v21 = vsel %vm41_vm0, %v35_v16, 0.0  ;;  %v40_v27 = vunpack.c.h.bf16 %v1222_v17  ;;  %v39_v29 = vunpack.c.l.bf16 %v1222_v17  ;;  %v272_v33 = vld [vmem:[%s1579_s2 + $0x38] sm:$0xff]  ;;  %v269_v35 = vld [vmem:[%s1579_s2 + $0x20] sm:$0xff]  ;;  %v270_v36 = vld [vmem:[%s1579_s2 + $0x28] sm:$0xff] }
   0x8   :  { %994 = vmatprep.mubr.msk.bf16.mxu1 %vm41_vm0, %v1215_v14  ;;  %49 = vadd.xlane.f32.xlu1 %v48_v21  ;;  %v51_v22 = vsel %vm41_vm0, %v36_v19, 0.0  ;;  %v45_v24 = vsel %vm41_vm0, %v34_v20, 0.0  ;;  %v57_v26 = vsel %vm41_vm0, %v38_v23, 0.0  ;;  %v54_v28 = vsel %vm41_vm0, %v37_v25, 0.0  ;;  %v267_v38 = vld [vmem:[%s1579_s2 + $0x10] sm:$0xff]  ;;  %v268_v39 = vld [vmem:[%s1579_s2 + $0x18] sm:$0xff] }
   0x9   :  { %985 = vmatpush3.bf16.msra.mxu0 %v95_v8  ;;  %43 = vadd.xlane.f32.xlu0 %v42_v18  ;;  %v63_v30 = vsel %vm41_vm0, %v40_v27, 0.0  ;;  %v60_v31 = vsel %vm41_vm0, %v39_v29, 0.0  ;;  %v276_v34 = vpack.c.bf16 %v272_v33, %v271_v32  ;;  %v275_v37 = vpack.c.bf16 %v270_v36, %v269_v35  ;;  %v265_v41 = vld [vmem:[%s1579_s2] sm:$0xff]  ;;  %v266_v42 = vld [vmem:[%s1579_s2 + $0x8] sm:$0xff] }
   0xa   :  { %993 = vmatpush3.bf16.msra.mxu1 %v97_v12  ;;  %v274_v40 = vpack.c.bf16 %v268_v39, %v267_v38  ;;  %v273_v43 = vpack.c.bf16 %v266_v42, %v265_v41  ;;  %vm277_vm1 = vcmask 523264   ;;  %v1135_v36 = vmov 0  }
   0xb   :  { %998 = vmatprep.subr.bf16.mxu1 %v276_v34  ;;  %1064 = vset.pattern.permute.xlu1 %v1135_v36 }
   0xc   :  { %987 = vmatmul.mubr.msk.bf16.vlgmr.msra.gmra.mxu0 %vm41_vm0, %v1210_v13  ;;  %52 = vadd.xlane.f32.xlu1 %v51_v22 }
   0xd   :  { %995 = vmatmul.mubr.msk.bf16.vlgmr.msra.gmra.mxu1 %vm41_vm0, %v1222_v17  ;;  %46 = vadd.xlane.f32.xlu0 %v45_v24 }
   0xe   :  { %999 = vmatpush3.bf16.msra.mxu1 %v276_v34  ;;  %1063 = vset.pattern.permute.xlu0 %v1135_v36 }
   0xf   :  { %1000 = vmatprep.subr.bf16.mxu1 %v275_v37 }
  0x10   :  { %58 = vadd.xlane.f32.xlu1 %v57_v26 }
  0x11   :  { %55 = vadd.xlane.f32.xlu0 %v54_v28 }
  0x12   :  { %1001 = vmatpush3.bf16.msra.mxu1 %v275_v37  ;;  %v351_v37 = vlaneseq }
  0x13   :  { %1002 = vmatprep.subr.bf16.mxu1 %v274_v40 }
  0x14   :  { %64 = vadd.xlane.f32.xlu1 %v63_v30  ;;  %v1306_v38 = vshrl.u32 %v351_v37, 7  ;;  %v1382_v37 = vld [vmem:[%s1582_s5] sm:$0xff] }
  0x15   :  { %61 = vadd.xlane.f32.xlu0 %v60_v31 }
  0x16   :  { %1003 = vmatpush3.bf16.msra.mxu1 %v274_v40  ;;  %v353_v39 = vsub.s32 0, %v1306_v38  ;;  %v1312_v40 = vld [vmem:[%s1581_s4] sm:$0x3] }
  0x17   :  { %1004 = vmatprep.subr.bf16.mxu1 %v273_v43 }
  0x18   :  { %v1315_v42 = vrot.slane %v1312_v40, %v353_v39  ;;  %v1389_v39 = vld [vmem:[%s1582_s5 + $0x8] sm:$0xff] }
  0x1a   :  { %1005 = vmatpush3.bf16.msra.mxu1 %v273_v43 }
  0x25   :  { %247 = vrot.lane.b32.xlu1 %v96_v3, %s1134_s23 }
  0x29   :  { %249 = vrot.lane.b32.xlu1 %v97_v12, %s1134_s23 }
  0x2b   :  { %245 = vrot.lane.b32.xlu0 %v95_v8, %s1134_s23 }
  0x2d   :  { %251 = vrot.lane.b32.xlu1 %v98_v7, %s1134_s23 }
  0x91   :  { %v50_v44 = vpop.xlane.xlu1 %49 }
  0x92   :  { %v44_v45 = vpop.xlane.xlu0 %43  ;;  %v68_v49 = vmax.f32 %v50_v44, 1.0 }
  0x93   :  { %v66_v51 = vmax.f32 %v44_v45, 1.0 }
  0x94   :  { %1080 = vrcp.f32 %v68_v49 }
  0x95   :  { %v53_v46 = vpop.xlane.xlu1 %52  ;;  %1082 = vrcp.f32 %v66_v51 }
  0x96   :  { %v47_v47 = vpop.xlane.xlu0 %46  ;;  %v69_v52 = vmax.f32 %v53_v46, 1.0 }
  0x97   :  { %v67_v54 = vmax.f32 %v47_v47, 1.0 }
  0x98   :  { %1084 = vrcp.f32 %v69_v52 }
  0x99   :  { %v59_v48 = vpop.xlane.xlu1 %58 }
  0x9a   :  { %v56_v50 = vpop.xlane.xlu0 %55  ;;  %v71_v55 = vmax.f32 %v59_v48, 1.0 }
  0x9b   :  { %v70_v53 = vmax.f32 %v56_v50, 1.0 }
  0x9d   :  { %v65_v56 = vpop.xlane.xlu1 %64  ;;  %1086 = vrcp.f32 %v70_v53 }
  0x9e   :  { %v62_v57 = vpop.xlane.xlu0 %61  ;;  %1088 = vrcp.f32 %v67_v54  ;;  %v73_v58 = vmax.f32 %v65_v56, 1.0 }
  0x9f   :  { %1090 = vrcp.f32 %v71_v55  ;;  %v72_v59 = vmax.f32 %v62_v57, 1.0 }
  0xa0   :  { %1092 = vrcp.f32 %v73_v58 }
  0xa1   :  { %1094 = vrcp.f32 %v72_v59  ;;  %v1270_v60 = vpop.eup %1080  ;;  %v248_v7 = vpop.permute.xlu1 %247 }
  0xa2   :  { %v1272_v62 = vpop.eup %1082  ;;  %v246_v23 = vpop.permute.xlu0 %245 }
  0xa5   :  { %v1274_v0 = vpop.eup %1084  ;;  %v250_v27 = vpop.permute.xlu1 %249 }
  0xa9   :  { %v252_v34 = vpop.permute.xlu1 %251 }
  0xaa   :  { %v1276_v2 = vpop.eup %1086 }
  0xab   :  { %v1278_v4 = vpop.eup %1088 }
  0xac   :  { %v1280_v6 = vpop.eup %1090 }
  0xad   :  { %v1287_v20 = vpop.eup %1092 }
  0xae   :  { %v1290_v24 = vpop.eup %1094 }
  0xcc   :  { %v988_v61 = vpop.f32.mrf.mxu0 }
  0xcd   :  { %v996_v63 = vpop.f32.mrf.mxu1  ;;  %v231_v10 = vmul.f32 %v1270_v60, %v988_v61 }
  0xce   :  { %v149_v1 = vpop.f32.mrf.mxu0  ;;  %v235_v29 = vmul.f32 %v1290_v24, %v996_v63 }
  0xcf   :  { %v214_v3 = vpop.f32.mrf.mxu1  ;;  %v229_v16 = vmul.f32 %v1272_v62, %v149_v1 }
  0xd0   :  { %v989_v5 = vpop.f32.mrf.mxu0  ;;  %v233_v12 = vmul.f32 %v1276_v2, %v214_v3 }
  0xd1   :  { %v232_v8 = vmul.f32 %v1274_v0, %v989_v5  ;;  %v997_v9 = vpop.f32.mrf.mxu1 }
  0xd2   :  { %v152_v15 = vpop.f32.mrf.mxu0  ;;  %v236_v30 = vmul.f32 %v1287_v20, %v997_v9 }
  0xd3   :  { %v230_v18 = vmul.f32 %v1278_v4, %v152_v15  ;;  %v217_v19 = vpop.f32.mrf.mxu1  ;;  %v238_v21 = vpack.c.bf16 %v232_v8, %v231_v10 }
  0xd4   :  { %v234_v22 = vmul.f32 %v1280_v6, %v217_v19  ;;  %v240_v33 = vpack.c.bf16 %v236_v30, %v235_v29 }
  0xd5   :  { %v237_v25 = vpack.c.bf16 %v230_v18, %v229_v16  ;;  %v258_v32 = vsel %vm41_vm0, %v238_v21, %v248_v7 }
  0xd6   :  { %v239_v26 = vpack.c.bf16 %v234_v22, %v233_v12  ;;  %v264_v35 = vsel %vm41_vm0, %v240_v33, %v252_v34  ;;  %v1369_v33 = vld [vmem:[%s1582_s5 + $0x18] sm:$0xff]  ;;  %v1375_v34 = vld [vmem:[%s1582_s5 + $0x10] sm:$0xff]  ;;  %s1137_s5 = smov 64  }
  0xd7   :  { %v255_v28 = vsel %vm41_vm0, %v237_v25, %v246_v23 }
  0xd8   :  { %v261_v31 = vsel %vm41_vm0, %v239_v26, %v250_v27  ;;  %1006 = vmatprep.mubr.msk.bf16.mxu1 %vm277_vm1, %v255_v28 }
  0xd9   :  { %1007 = vmatmul.mubr.msk.bf16.vlgmr.msra.gmra.mxu1 %vm277_vm1, %v258_v32 }
  0xda   :  { %1010 = vmatprep.mubr.msk.bf16.mxu1 %vm277_vm1, %v261_v31 }
  0xe1   :  { %1011 = vmatmul.mubr.msk.bf16.gmra.mxu1 %vm277_vm1, %v264_v35  ;;  %v1136_v35 = vmov 1  }
  0xe2   :  { %1018 = vmatprep.mubr.msk.bf16.mxu1 %vm41_vm0, %v1205_v11 }
 0x199   :  { %v1008_v41 = vpop.f32.mrf.mxu1 }
 0x19a   :  { %v357_v43 = vadd.f32 %v1008_v41, %v1315_v42 }
 0x19b   :  { %v320_v11 = vpop.f32.mrf.mxu1 }
 0x19c   :  { %v1319_v47 = vmax.f32 %v357_v43, 0.0  ;;  %v355_v54 = vadd.f32 %v1315_v42, %v320_v11 }
 0x19d   :  { %v1009_v44 = vpop.f32.mrf.mxu1 }
 0x19e   :  { %v358_v49 = vadd.f32 %v1009_v44, %v1315_v42  ;;  %v381_v56 = vsel %vm277_vm1, %v1319_v47, 0.0  ;;  %v397_v57 = vmul.f32 %v1319_v47, %v1319_v47  ;;  %v1343_v8 = vmax.f32 %v355_v54, 0.0 }
 0x19f   :  { %v323_v45 = vpop.f32.mrf.mxu1 }
 0x1a0   :  { %v356_v46 = vadd.f32 %v1315_v42, %v323_v45  ;;  %v1331_v58 = vmax.f32 %v358_v49, 0.0  ;;  %v413_v9 = vsel %vm277_vm1, %v397_v57, 0.0  ;;  %v371_v21 = vsel %vm277_vm1, %v1343_v8, 0.0 }
 0x1a1   :  { %v1012_v48 = vpop.f32.mrf.mxu1  ;;  %v395_v22 = vmul.f32 %v1343_v8, %v1343_v8 }
 0x1a2   :  { %v361_v50 = vadd.f32 %v1012_v48, %v1315_v42  ;;  %v386_v10 = vsel %vm277_vm1, %v1331_v58, 0.0  ;;  %v398_v28 = vmul.f32 %v1331_v58, %v1331_v58 }
 0x1a3   :  { %v336_v51 = vpop.f32.mrf.mxu1  ;;  %v403_v27 = vsel %vm277_vm1, %v395_v22, 0.0 }
 0x1a4   :  { %v1323_v52 = vmax.f32 %v361_v50, 0.0  ;;  %v359_v53 = vadd.f32 %v1315_v42, %v336_v51  ;;  %v418_v31 = vsel %vm277_vm1, %v398_v28, 0.0 }
 0x1a5   :  { %v1013_v55 = vpop.f32.mrf.mxu1 }
 0x1a6   :  { %v362_v59 = vadd.f32 %v1013_v55, %v1315_v42  ;;  %v382_v61 = vsel %vm277_vm1, %v1323_v52, 0.0  ;;  %v401_v63 = vmul.f32 %v1323_v52, %v1323_v52  ;;  %v1338_v3 = vmax.f32 %v359_v53, 0.0 }
 0x1a7   :  { %v383_v1 = vadd.f32 %v382_v61, %v381_v56  ;;  %v339_v41 = vpop.f32.mrf.mxu1 }
 0x1a8   :  { %v1340_v5 = vmax.f32 %v362_v59, 0.0  ;;  %v414_v7 = vsel %vm277_vm1, %v401_v63, 0.0  ;;  %v372_v18 = vsel %vm277_vm1, %v1338_v3, 0.0  ;;  %v399_v19 = vmul.f32 %v1338_v3, %v1338_v3 }
 0x1a9   :  { %384 = vadd.xlane.f32.xlu0 %v383_v1  ;;  %v415_v15 = vadd.f32 %v414_v7, %v413_v9  ;;  %v373_v23 = vadd.f32 %v372_v18, %v371_v21  ;;  %v360_v11 = vadd.f32 %v1315_v42, %v339_v41 }
 0x1aa   :  { %v387_v12 = vsel %vm277_vm1, %v1340_v5, 0.0  ;;  %v404_v25 = vsel %vm277_vm1, %v399_v19, 0.0  ;;  %v402_v26 = vmul.f32 %v1340_v5, %v1340_v5 }
 0x1ab   :  { %v388_v16 = vadd.f32 %v387_v12, %v386_v10  ;;  %v405_v29 = vadd.f32 %v404_v25, %v403_v27  ;;  %v1395_v43 = vmax.f32 %v360_v11, 0.0 }
 0x1ac   :  { %v419_v30 = vsel %vm277_vm1, %v402_v26, 0.0 }
 0x1ad   :  { %416 = vadd.xlane.f32.xlu0 %v415_v15  ;;  %389 = vadd.xlane.f32.xlu1 %v388_v16  ;;  %v420_v32 = vadd.f32 %v419_v30, %v418_v31  ;;  %v377_v44 = vsel %vm277_vm1, %v1395_v43, 0.0  ;;  %v400_v45 = vmul.f32 %v1395_v43, %v1395_v43 }
 0x1af   :  { %v409_v51 = vsel %vm277_vm1, %v400_v45, 0.0 }
 0x1b1   :  { %374 = vadd.xlane.f32.xlu0 %v373_v23 }
 0x1b5   :  { %406 = vadd.xlane.f32.xlu0 %v405_v29 }
 0x1b9   :  { %421 = vadd.xlane.f32.xlu0 %v420_v32 }
 0x1be   :  { %480 = vperm.xlu1 %1064, %v1369_v33  }
 0x1c2   :  { %1065 = vset.pattern.permute.xlu1 %v1136_v35 }
 0x1c3   :  { %500 = vperm.xlu1 %1065, %v1375_v34  }
 0x1c7   :  { %504 = vperm.xlu1 %1065, %v1369_v33  }
 0x1cb   :  { %1066 = vset.pattern.permute.xlu1 %v1135_v36  ;;  %v1397_v36 = vmax.f32 %v356_v46, 0.0 }
 0x1cc   :  { %465 = vperm.xlu1 %1066, %v1382_v37  }
 0x1cd   :  { %v376_v48 = vsel %vm277_vm1, %v1397_v36, 0.0  ;;  %v396_v49 = vmul.f32 %v1397_v36, %v1397_v36 }
 0x1ce   :  { %v378_v50 = vadd.f32 %v377_v44, %v376_v48 }
 0x1cf   :  { %475 = vperm.xlu0 %1063, %v1375_v34   ;;  %v408_v42 = vsel %vm277_vm1, %v396_v49, 0.0 }
 0x1d0   :  { %470 = vperm.xlu1 %1066, %v1389_v39   ;;  %v410_v46 = vadd.f32 %v409_v51, %v408_v42 }
 0x1d4   :  { %1067 = vset.pattern.permute.xlu1 %v1136_v35 }
 0x1d5   :  { %492 = vperm.xlu1 %1067, %v1382_v37  }
 0x1f9   :  { %379 = vadd.xlane.f32.xlu1 %v378_v50 }
 0x1fd   :  { %411 = vadd.xlane.f32.xlu1 %v410_v46 }
 0x20e   :  { %496 = vperm.xlu1 %1067, %v1389_v39  }
 0x232   :  { %v385_v53 = vpop.xlane.xlu0 %384 }
 0x233   :  { %v393_v54 = vmul.f32 0.0078125, %v385_v53 }
 0x235   :  { %v429_v56 = vmul.f32 %v393_v54, %v393_v54  ;;  %v441_v31 = vsub.f32 %v1319_v47, %v393_v54  ;;  %v445_v50 = vsub.f32 %v1323_v52, %v393_v54 }
 0x236   :  { %v417_v55 = vpop.xlane.xlu0 %416  ;;  %v390_v1 = vpop.xlane.xlu1 %389 }
 0x237   :  { %v425_v57 = vmul.f32 0.0078125, %v417_v55  ;;  %v394_v10 = vmul.f32 0.0078125, %v390_v1 }
 0x239   :  { %v433_v59 = vsub.f32 %v425_v57, %v429_v56  ;;  %v430_v23 = vmul.f32 %v394_v10, %v394_v10  ;;  %v442_v51 = vsub.f32 %v1331_v58, %v394_v10  ;;  %v446_v42 = vsub.f32 %v1340_v5, %v394_v10 }
 0x23a   :  { %v375_v61 = vpop.xlane.xlu0 %374  ;;  %v481_v29 = vpop.permute.xlu1 %480 }
 0x23b   :  { %v391_v63 = vmul.f32 0.0078125, %v375_v61  ;;  %v437_v7 = vmax.f32 %v433_v59, 0.0 }
 0x23d   :  { %v427_v12 = vmul.f32 %v391_v63, %v391_v63  ;;  %v449_v16 = vadd.f32 1e-05, %v437_v7  ;;  %v439_v32 = vsub.f32 %v1343_v8, %v391_v63  ;;  %v443_v35 = vsub.f32 %v1338_v3, %v391_v63 }
 0x23e   :  { %v407_v9 = vpop.xlane.xlu0 %406  ;;  %v501_v48 = vpop.permute.xlu1 %500 }
 0x23f   :  { %v423_v15 = vmul.f32 0.0078125, %v407_v9  ;;  %1096 = vrsqrt.f32 %v449_v16 }
 0x241   :  { %v431_v18 = vsub.f32 %v423_v15, %v427_v12 }
 0x242   :  { %v422_v19 = vpop.xlane.xlu0 %421  ;;  %v505_v3 = vpop.permute.xlu1 %504 }
 0x243   :  { %v435_v21 = vmax.f32 %v431_v18, 0.0  ;;  %v426_v22 = vmul.f32 0.0078125, %v422_v19 }
 0x245   :  { %v447_v25 = vadd.f32 1e-05, %v435_v21  ;;  %v434_v26 = vsub.f32 %v426_v22, %v430_v23 }
 0x247   :  { %1098 = vrsqrt.f32 %v447_v25  ;;  %v438_v27 = vmax.f32 %v434_v26, 0.0  ;;  %v466_v58 = vpop.permute.xlu1 %465  ;;  %v671_v26 = vld [vmem:[%s1580_s3 + $0x70] sm:$0xff] }
 0x249   :  { %v450_v28 = vadd.f32 1e-05, %v438_v27  ;;  %v672_v27 = vld [vmem:[%s1580_s3 + $0x78] sm:$0xff] }
 0x24a   :  { %v476_v49 = vpop.permute.xlu0 %475 }
 0x24b   :  { %1100 = vrsqrt.f32 %v450_v28  ;;  %v471_v5 = vpop.permute.xlu1 %470  ;;  %v669_v28 = vld [vmem:[%s1580_s3 + $0x60] sm:$0xff] }
 0x24c   :  { %v1097_v30 = vpop.eup %1096 }
 0x24d   :  { %v457_v45 = vmul.f32 %v1097_v30, %v441_v31  ;;  %v461_v47 = vmul.f32 %v1097_v30, %v445_v50  ;;  %v680_v30 = vpack.c.bf16 %v672_v27, %v671_v26 }
 0x24f   :  { %v485_v56 = vmul.f32 %v476_v49, %v457_v45  ;;  %v489_v61 = vmul.f32 %v476_v49, %v461_v47  ;;  %v668_v45 = vld [vmem:[%s1580_s3 + $0x58] sm:$0xff]  ;;  %1030 = vmatprep.subr.bf16.mxu0 %v680_v30 }
 0x250   :  { %v493_v54 = vpop.permute.xlu1 %492  ;;  %1031 = vmatpush3.bf16.msra.mxu0 %v680_v30 }
 0x251   :  { %v509_v63 = vadd.f32 %v501_v48, %v485_v56  ;;  %v513_v9 = vadd.f32 %v501_v48, %v489_v61 }
 0x254   :  { %v1099_v41 = vpop.eup %1098 }
 0x255   :  { %v455_v11 = vmul.f32 %v1099_v41, %v439_v32  ;;  %v459_v44 = vmul.f32 %v1099_v41, %v443_v35  ;;  %v667_v41 = vld [vmem:[%s1580_s3 + $0x50] sm:$0xff] }
 0x257   :  { %v483_v31 = vmul.f32 %v466_v58, %v455_v11 }
 0x258   :  { %v1101_v46 = vpop.eup %1100 }
 0x259   :  { %v458_v53 = vmul.f32 %v1101_v46, %v442_v51  ;;  %v462_v55 = vmul.f32 %v1101_v46, %v446_v42  ;;  %v678_v51 = vpack.c.bf16 %v668_v45, %v667_v41  ;;  %v487_v42 = vmul.f32 %v466_v58, %v459_v44  ;;  %v663_v44 = vld [vmem:[%s1580_s3 + $0x30] sm:$0xff] }
 0x25a   :  { %v507_v11 = vadd.f32 %v493_v54, %v483_v31 }
 0x25b   :  { %v486_v8 = vmul.f32 %v481_v29, %v458_v53  ;;  %v490_v57 = vmul.f32 %v481_v29, %v462_v55  ;;  %v665_v53 = vld [vmem:[%s1580_s3 + $0x40] sm:$0xff]  ;;  %v666_v55 = vld [vmem:[%s1580_s3 + $0x48] sm:$0xff] }
 0x25d   :  { %v510_v59 = vadd.f32 %v505_v3, %v486_v8  ;;  %v514_v1 = vadd.f32 %v505_v3, %v490_v57  ;;  %v677_v8 = vpack.c.bf16 %v666_v55, %v665_v53  ;;  %v511_v57 = vadd.f32 %v493_v54, %v487_v42  ;;  %v664_v3 = vld [vmem:[%s1580_s3 + $0x38] sm:$0xff] }
 0x25e   :  { %v676_v61 = vpack.c.bf16 %v664_v3, %v663_v44 }
 0x25f   :  { %v516_v7 = vpack.c.bf16 %v510_v59, %v509_v63  ;;  %v518_v52 = vpack.c.bf16 %v514_v1, %v513_v9  ;;  %v661_v63 = vld [vmem:[%s1580_s3 + $0x20] sm:$0xff] }
 0x260   :  { %v657_v9 = vld [vmem:[%s1580_s3] sm:$0xff] }
 0x261   :  { %635 = vrot.lane.b32.xlu0 %v516_v7, %s1137_s5  ;;  %1014 = vmatprep.subr.bf16.mxu1 %v516_v7 }
 0x262   :  { %1015 = vmatpush3.bf16.msra.mxu1 %v516_v7  ;;  %v660_v7 = vld [vmem:[%s1580_s3 + $0x18] sm:$0xff] }
 0x265   :  { %639 = vrot.lane.b32.xlu0 %v518_v52, %s1137_s5 }
 0x282   :  { %v380_v10 = vpop.xlane.xlu1 %379 }
 0x283   :  { %v392_v12 = vmul.f32 0.0078125, %v380_v10 }
 0x285   :  { %v428_v16 = vmul.f32 %v392_v12, %v392_v12  ;;  %v440_v23 = vsub.f32 %v1397_v36, %v392_v12  ;;  %v444_v25 = vsub.f32 %v1395_v43, %v392_v12  ;;  %v670_v36 = vld [vmem:[%s1580_s3 + $0x68] sm:$0xff] }
 0x286   :  { %v412_v15 = vpop.xlane.xlu1 %411  ;;  %v679_v35 = vpack.c.bf16 %v670_v36, %v669_v28 }
 0x287   :  { %v424_v18 = vmul.f32 0.0078125, %v412_v15 }
 0x288   :  { %1032 = vmatprep.subr.bf16.mxu0 %v679_v35 }
 0x289   :  { %v432_v19 = vsub.f32 %v424_v18, %v428_v16  ;;  %1033 = vmatpush3.bf16.msra.mxu0 %v679_v35 }
 0x28a   :  { %v497_v50 = vpop.permute.xlu1 %496  ;;  %1034 = vmatprep.subr.bf16.mxu0 %v678_v51 }
 0x28b   :  { %v436_v21 = vmax.f32 %v432_v19, 0.0 }
 0x28d   :  { %v448_v22 = vadd.f32 1e-05, %v436_v21  ;;  %1035 = vmatpush3.bf16.msra.mxu0 %v678_v51 }
 0x28e   :  { %1036 = vmatprep.subr.bf16.mxu0 %v677_v8 }
 0x28f   :  { %1102 = vrsqrt.f32 %v448_v22 }
 0x291   :  { %1037 = vmatpush3.bf16.msra.mxu0 %v677_v8 }
 0x292   :  { %1038 = vmatprep.subr.bf16.mxu0 %v676_v61 }
 0x295   :  { %1039 = vmatpush3.bf16.msra.mxu0 %v676_v61 }
 0x29c   :  { %v1103_v29 = vpop.eup %1102 }
 0x29d   :  { %v456_v43 = vmul.f32 %v1103_v29, %v440_v23  ;;  %v460_v32 = vmul.f32 %v1103_v29, %v444_v25 }
 0x29f   :  { %v484_v48 = vmul.f32 %v471_v5, %v456_v43  ;;  %v488_v49 = vmul.f32 %v471_v5, %v460_v32 }
 0x2a1   :  { %v508_v46 = vadd.f32 %v497_v50, %v484_v48  ;;  %v512_v47 = vadd.f32 %v497_v50, %v488_v49  ;;  %v1138_v48 = vmov 2  }
 0x2a2   :  { %1069 = vset.pattern.permute.xlu1 %v1138_v48  ;;  %1068 = vset.pattern.permute.xlu0 %v1138_v48 }
 0x2a3   :  { %v515_v56 = vpack.c.bf16 %v508_v46, %v507_v11  ;;  %v517_v59 = vpack.c.bf16 %v512_v47, %v511_v57 }
 0x2a5   :  { %633 = vrot.lane.b32.xlu1 %v515_v56, %s1137_s5  ;;  %1016 = vmatprep.subr.bf16.mxu1 %v515_v56 }
 0x2a6   :  { %1017 = vmatpush3.bf16.msra.mxu1 %v515_v56 }
 0x2a7   :  { %1022 = vmatprep.subr.bf16.mxu1 %v518_v52 }
 0x2a9   :  { %637 = vrot.lane.b32.xlu1 %v517_v59, %s1137_s5  ;;  %1019 = vmatmul.mubr.msk.bf16.vlgmr.msra.gmra.mxu1 %vm41_vm0, %v1210_v13  ;;  %v662_v13 = vld [vmem:[%s1580_s3 + $0x28] sm:$0xff] }
 0x2aa   :  { %1023 = vmatpush3.bf16.msra.mxu1 %v518_v52  ;;  %1026 = vmatprep.mubr.msk.bf16.mxu1 %vm41_vm0, %v1215_v14  ;;  %v675_v1 = vpack.c.bf16 %v662_v13, %v661_v63  ;;  %v659_v14 = vld [vmem:[%s1580_s3 + $0x10] sm:$0xff]  ;;  %v658_v52 = vld [vmem:[%s1580_s3 + $0x8] sm:$0xff]  ;;  %s1140_s3 = smov [#allocation2]  }
 0x2ab   :  { %1024 = vmatprep.subr.bf16.mxu1 %v517_v59  ;;  %v673_v58 = vpack.c.bf16 %v658_v52, %v657_v9  ;;  %s919_s21 = sshll.u32 %s1140_s3, 4  ;;  %s920_s21 = int_to_ptr.vmem [resolvable:$true] %s919_s21 }
 0x2ac   :  { %1040 = vmatprep.subr.bf16.mxu0 %v675_v1  ;;  %s1112_s22 = scalar_lea.vmem %s920_s21, 1024  ;;  %p1117_p1 = scmp.lt.s32.totalorder %s920_s21, %s920_s21 }
 0x2ad   :  { %1041 = vmatpush3.bf16.msra.mxu0 %v675_v1  ;;  %p1113_p0 = scmp.ne.s32.totalorder %s920_s21, %s1112_s22  ;;  %p1118_p2 = scmp.lt.s32.totalorder %s1112_s22, %s1112_s22 }
 0x2ae   :  { %1025 = vmatpush3.bf16.msra.mxu1 %v517_v59 }
 0x2af   :  { %p1119_p3 = por %p1118_p2, %p1117_p1 }
 0x2b1   :  { %1027 = vmatmul.mubr.msk.bf16.vlgmr.msra.gmra.mxu1 %vm41_vm0, %v1222_v17  ;;  %v674_v17 = vpack.c.bf16 %v660_v7, %v659_v14  ;;  %p1120_p4 = pnand %p1119_p3, %p1113_p0 }
 0x2b3   :  { %1042 = vmatprep.subr.bf16.mxu0 %v674_v17 }
 0x2b4   :  { %1043 = vmatpush3.bf16.msra.mxu0 %v674_v17 }
 0x2b5   :  { %1044 = vmatprep.subr.bf16.mxu0 %v673_v58 }
 0x2b8   :  { %1045 = vmatpush3.bf16.msra.mxu0 %v673_v58 }
 0x2d3   :  { %v636_v27 = vpop.permute.xlu0 %635 }
 0x2d7   :  { %v640_v35 = vpop.permute.xlu0 %639 }
 0x317   :  { %v634_v25 = vpop.permute.xlu1 %633 }
 0x31b   :  { %v638_v32 = vpop.permute.xlu1 %637 }
 0x369   :  { %v1020_v5 = vpop.f32.mrf.mxu1 }
 0x36a   :  { %v619_v15 = vmul.f32 %v1270_v60, %v1020_v5 }
 0x36b   :  { %v553_v54 = vpop.f32.mrf.mxu1 }
 0x36c   :  { %v617_v18 = vmul.f32 %v1272_v62, %v553_v54 }
 0x36d   :  { %v1021_v10 = vpop.f32.mrf.mxu1 }
 0x36e   :  { %v620_v12 = vmul.f32 %v1274_v0, %v1021_v10 }
 0x36f   :  { %v556_v16 = vpop.f32.mrf.mxu1 }
 0x370   :  { %v618_v19 = vmul.f32 %v1278_v4, %v556_v16  ;;  %v626_v21 = vpack.c.bf16 %v620_v12, %v619_v15 }
 0x371   :  { %v1028_v22 = vpop.f32.mrf.mxu1 }
 0x372   :  { %v625_v23 = vpack.c.bf16 %v618_v19, %v617_v18  ;;  %v647_v30 = vsel %vm277_vm1, %v626_v21, %v636_v27  ;;  %v623_v60 = vmul.f32 %v1290_v24, %v1028_v22 }
 0x373   :  { %v602_v26 = vpop.f32.mrf.mxu1 }
 0x374   :  { %v643_v28 = vsel %vm277_vm1, %v625_v23, %v634_v25  ;;  %v621_v4 = vmul.f32 %v1276_v2, %v602_v26 }
 0x375   :  { %v1029_v29 = vpop.f32.mrf.mxu1  ;;  %1046 = vmatprep.mubr.bf16.mxu0 %v643_v28 }
 0x376   :  { %v624_v0 = vmul.f32 %v1287_v20, %v1029_v29  ;;  %1047 = vmatmul.mubr.bf16.vlgmr.msra.gmra.mxu0 %v647_v30  ;;  %v748_v20 = vsub.s32 1, %v1306_v38 }
 0x377   :  { %v605_v62 = vpop.f32.mrf.mxu1 }
 0x378   :  { %v622_v36 = vmul.f32 %v1280_v6, %v605_v62  ;;  %v628_v31 = vpack.c.bf16 %v624_v0, %v623_v60  ;;  %v749_v2 = vrot.slane %v1312_v40, %v748_v20  ;;  %v1139_v0 = vmov 3  }
 0x37a   :  { %v627_v43 = vpack.c.bf16 %v622_v36, %v621_v4  ;;  %v655_v45 = vsel %vm277_vm1, %v628_v31, %v640_v35 }
 0x37c   :  { %v651_v41 = vsel %vm277_vm1, %v627_v43, %v638_v32 }
 0x37d   :  { %1050 = vmatprep.mubr.bf16.mxu0 %v651_v41 }
 0x37e   :  { %1051 = vmatmul.mubr.bf16.gmra.mxu0 %v655_v45 }
 0x436   :  { %v1048_v24 = vpop.f32.mrf.mxu0 }
 0x437   :  { %v752_v6 = vadd.f32 %v1048_v24, %v749_v2 }
 0x438   :  { %v715_v49 = vpop.f32.mrf.mxu0 }
 0x439   :  { %v750_v51 = vadd.f32 %v749_v2, %v715_v49  ;;  %v1490_v11 = vmax.f32 %v752_v6, 0.0 }
 0x43a   :  { %v1049_v50 = vpop.f32.mrf.mxu0 }
 0x43b   :  { %v1492_v53 = vmax.f32 %v750_v51, 0.0  ;;  %v753_v47 = vadd.f32 %v1049_v50, %v749_v2  ;;  %v776_v40 = vsel %vm277_vm1, %v1490_v11, 0.0  ;;  %v792_v26 = vmul.f32 %v1490_v11, %v1490_v11 }
 0x43c   :  { %v718_v42 = vpop.f32.mrf.mxu0 }
 0x43d   :  { %v751_v38 = vadd.f32 %v749_v2, %v718_v42  ;;  %v790_v63 = vmul.f32 %v1492_v53, %v1492_v53  ;;  %v1504_v13 = vmax.f32 %v753_v47, 0.0  ;;  %v766_v7 = vsel %vm277_vm1, %v1492_v53, 0.0 }
 0x43e   :  { %v1052_v46 = vpop.f32.mrf.mxu0  ;;  %v808_v29 = vsel %vm277_vm1, %v792_v26, 0.0 }
 0x43f   :  { %v756_v55 = vadd.f32 %v1052_v46, %v749_v2  ;;  %v1514_v5 = vmax.f32 %v751_v38, 0.0  ;;  %v798_v12 = vsel %vm277_vm1, %v790_v63, 0.0  ;;  %v781_v19 = vsel %vm277_vm1, %v1504_v13, 0.0 }
 0x440   :  { %v731_v56 = vpop.f32.mrf.mxu0  ;;  %v793_v62 = vmul.f32 %v1504_v13, %v1504_v13 }
 0x441   :  { %v1494_v8 = vmax.f32 %v756_v55, 0.0  ;;  %v754_v57 = vadd.f32 %v749_v2, %v731_v56  ;;  %v771_v25 = vsel %vm277_vm1, %v1514_v5, 0.0 }
 0x442   :  { %v1053_v44 = vpop.f32.mrf.mxu0  ;;  %v813_v31 = vsel %vm277_vm1, %v793_v62, 0.0 }
 0x443   :  { %v1498_v3 = vmax.f32 %v754_v57, 0.0  ;;  %v757_v59 = vadd.f32 %v1053_v44, %v749_v2  ;;  %v777_v61 = vsel %vm277_vm1, %v1494_v8, 0.0  ;;  %v796_v22 = vmul.f32 %v1494_v8, %v1494_v8 }
 0x444   :  { %v734_v1 = vpop.f32.mrf.mxu0  ;;  %v778_v14 = vadd.f32 %v777_v61, %v776_v40 }
 0x445   :  { %v1508_v17 = vmax.f32 %v757_v59, 0.0  ;;  %v755_v9 = vadd.f32 %v749_v2, %v734_v1  ;;  %v767_v52 = vsel %vm277_vm1, %v1498_v3, 0.0  ;;  %v794_v58 = vmul.f32 %v1498_v3, %v1498_v3 }
 0x446   :  { %779 = vadd.xlane.f32.xlu0 %v778_v14  ;;  %v768_v54 = vadd.f32 %v767_v52, %v766_v7  ;;  %v809_v28 = vsel %vm277_vm1, %v796_v22, 0.0 }
 0x447   :  { %v1516_v10 = vmax.f32 %v755_v9, 0.0  ;;  %v799_v15 = vsel %vm277_vm1, %v794_v58, 0.0  ;;  %v782_v16 = vsel %vm277_vm1, %v1508_v17, 0.0  ;;  %v810_v30 = vadd.f32 %v809_v28, %v808_v29 }
 0x448   :  { %769 = vadd.xlane.f32.xlu1 %v768_v54  ;;  %v800_v18 = vadd.f32 %v799_v15, %v798_v12  ;;  %v783_v23 = vadd.f32 %v782_v16, %v781_v19  ;;  %v797_v60 = vmul.f32 %v1508_v17, %v1508_v17 }
 0x449   :  { %v772_v21 = vsel %vm277_vm1, %v1516_v10, 0.0  ;;  %v795_v36 = vmul.f32 %v1516_v10, %v1516_v10 }
 0x44a   :  { %801 = vadd.xlane.f32.xlu0 %v800_v18  ;;  %v773_v27 = vadd.f32 %v772_v21, %v771_v25  ;;  %v814_v4 = vsel %vm277_vm1, %v797_v60, 0.0 }
 0x44b   :  { %v815_v43 = vadd.f32 %v814_v4, %v813_v31 }
 0x44c   :  { %784 = vadd.xlane.f32.xlu1 %v783_v23 }
 0x44e   :  { %774 = vadd.xlane.f32.xlu0 %v773_v27 }
 0x452   :  { %811 = vadd.xlane.f32.xlu0 %v810_v30 }
 0x45d   :  { %863 = vperm.xlu1 %1069, %v1389_v39  }
 0x461   :  { %867 = vperm.xlu1 %1069, %v1375_v34  }
 0x465   :  { %871 = vperm.xlu1 %1069, %v1369_v33  }
 0x468   :  { %859 = vperm.xlu0 %1068, %v1382_v37  }
 0x469   :  { %1070 = vset.pattern.permute.xlu1 %v1139_v0 }
 0x46a   :  { %883 = vperm.xlu1 %1070, %v1382_v37   ;;  %v791_v37 = vmul.f32 %v1514_v5, %v1514_v5 }
 0x46c   :  { %1071 = vset.pattern.permute.xlu0 %v1139_v0 }
 0x46e   :  { %887 = vperm.xlu1 %1070, %v1389_v39   ;;  %v804_v39 = vsel %vm277_vm1, %v795_v36, 0.0 }
 0x472   :  { %891 = vperm.xlu1 %1070, %v1375_v34   ;;  %v803_v34 = vsel %vm277_vm1, %v791_v37, 0.0 }
 0x473   :  { %v805_v32 = vadd.f32 %v804_v39, %v803_v34 }
 0x496   :  { %816 = vadd.xlane.f32.xlu1 %v815_v43 }
 0x49a   :  { %806 = vadd.xlane.f32.xlu1 %v805_v32 }
 0x4ab   :  { %895 = vperm.xlu1 %1070, %v1369_v33  }
 0x4cf   :  { %v780_v35 = vpop.xlane.xlu0 %779 }
 0x4d0   :  { %v788_v50 = vmul.f32 0.0078125, %v780_v35 }
 0x4d1   :  { %v770_v41 = vpop.xlane.xlu1 %769 }
 0x4d2   :  { %v786_v45 = vmul.f32 0.0078125, %v770_v41  ;;  %v824_v47 = vmul.f32 %v788_v50, %v788_v50  ;;  %v836_v16 = vsub.f32 %v1490_v11, %v788_v50  ;;  %v840_v18 = vsub.f32 %v1494_v8, %v788_v50 }
 0x4d3   :  { %v802_v48 = vpop.xlane.xlu0 %801 }
 0x4d4   :  { %v818_v20 = vmul.f32 0.0078125, %v802_v48  ;;  %v822_v24 = vmul.f32 %v786_v45, %v786_v45  ;;  %v834_v59 = vsub.f32 %v1492_v53, %v786_v45  ;;  %v838_v61 = vsub.f32 %v1498_v3, %v786_v45 }
 0x4d5   :  { %v785_v2 = vpop.xlane.xlu1 %784 }
 0x4d6   :  { %v826_v49 = vsub.f32 %v818_v20, %v822_v24  ;;  %v789_v27 = vmul.f32 0.0078125, %v785_v2 }
 0x4d7   :  { %v775_v6 = vpop.xlane.xlu0 %774 }
 0x4d8   :  { %v830_v51 = vmax.f32 %v826_v49, 0.0  ;;  %v787_v28 = vmul.f32 0.0078125, %v775_v6  ;;  %v825_v8 = vmul.f32 %v789_v27, %v789_v27  ;;  %v837_v39 = vsub.f32 %v1504_v13, %v789_v27 }
 0x4d9   :  { %v1554_v42 = vpop.permute.xlu1 %863  ;;  %v841_v34 = vsub.f32 %v1508_v17, %v789_v27 }
 0x4da   :  { %v842_v46 = vadd.f32 1e-05, %v830_v51  ;;  %v823_v4 = vmul.f32 %v787_v28, %v787_v28  ;;  %v835_v45 = vsub.f32 %v1514_v5, %v787_v28  ;;  %v839_v48 = vsub.f32 %v1516_v10, %v787_v28 }
 0x4db   :  { %v812_v55 = vpop.xlane.xlu0 %811 }
 0x4dc   :  { %1104 = vrsqrt.f32 %v842_v46  ;;  %v820_v56 = vmul.f32 0.0078125, %v812_v55 }
 0x4dd   :  { %v868_v57 = vpop.permute.xlu1 %867 }
 0x4de   :  { %v828_v33 = vsub.f32 %v820_v56, %v824_v47 }
 0x4e0   :  { %v832_v38 = vmax.f32 %v828_v33, 0.0 }
 0x4e1   :  { %v872_v40 = vpop.permute.xlu1 %871 }
 0x4e2   :  { %v844_v44 = vadd.f32 1e-05, %v832_v38 }
 0x4e3   :  { %v860_v14 = vpop.permute.xlu0 %859 }
 0x4e4   :  { %1106 = vrsqrt.f32 %v844_v44 }
 0x4e5   :  { %v884_v1 = vpop.permute.xlu1 %883 }
 0x4e9   :  { %v1105_v63 = vpop.eup %1104  ;;  %v888_v15 = vpop.permute.xlu1 %887 }
 0x4ea   :  { %v850_v7 = vmul.f32 %v1105_v63, %v834_v59  ;;  %v854_v9 = vmul.f32 %v1105_v63, %v838_v61 }
 0x4ec   :  { %v874_v52 = vmul.f32 %v860_v14, %v850_v7  ;;  %v878_v58 = vmul.f32 %v860_v14, %v854_v9 }
 0x4ed   :  { %v892_v23 = vpop.permute.xlu1 %891 }
 0x4ee   :  { %v898_v54 = vadd.f32 %v884_v1, %v874_v52  ;;  %v902_v12 = vadd.f32 %v884_v1, %v878_v58 }
 0x4f0   :  { %906 = vst.msk [vmem:[#allocation2] sm:$0xff] %vm277_vm1, %v898_v54  ;;  %910 = vst.msk [vmem:[#allocation2 + $0x20] sm:$0xff] %vm277_vm1, %v902_v12 }
 0x4f1   :  { %v1107_v53 = vpop.eup %1106 }
 0x4f2   :  { %v852_v3 = vmul.f32 %v1107_v53, %v836_v16  ;;  %v856_v19 = vmul.f32 %v1107_v53, %v840_v18 }
 0x4f4   :  { %v876_v21 = vmul.f32 %v868_v57, %v852_v3  ;;  %v880_v22 = vmul.f32 %v868_v57, %v856_v19 }
 0x4f6   :  { %v900_v25 = vadd.f32 %v892_v23, %v876_v21  ;;  %v904_v26 = vadd.f32 %v892_v23, %v880_v22 }
 0x4f8   :  { %908 = vst.msk [vmem:[#allocation2 + $0x10] sm:$0xff] %vm277_vm1, %v900_v25  ;;  %912 = vst.msk [vmem:[#allocation2 + $0x30] sm:$0xff] %vm277_vm1, %v904_v26 }
 0x51f   :  { %v817_v11 = vpop.xlane.xlu1 %816 }
 0x520   :  { %v821_v29 = vmul.f32 0.0078125, %v817_v11 }
 0x522   :  { %v829_v30 = vsub.f32 %v821_v29, %v825_v8 }
 0x523   :  { %v807_v0 = vpop.xlane.xlu1 %806 }
 0x524   :  { %v833_v60 = vmax.f32 %v829_v30, 0.0  ;;  %v819_v62 = vmul.f32 0.0078125, %v807_v0 }
 0x526   :  { %v845_v36 = vadd.f32 1e-05, %v833_v60  ;;  %v827_v31 = vsub.f32 %v819_v62, %v823_v4 }
 0x527   :  { %v896_v49 = vpop.permute.xlu1 %895 }
 0x528   :  { %1108 = vrsqrt.f32 %v845_v36  ;;  %v831_v37 = vmax.f32 %v827_v31, 0.0 }
 0x52a   :  { %v843_v43 = vadd.f32 1e-05, %v831_v37 }
 0x52c   :  { %1110 = vrsqrt.f32 %v843_v43 }
 0x535   :  { %v1109_v32 = vpop.eup %1108 }
 0x536   :  { %v853_v35 = vmul.f32 %v1109_v32, %v837_v39  ;;  %v857_v41 = vmul.f32 %v1109_v32, %v841_v34 }
 0x538   :  { %v877_v20 = vmul.f32 %v872_v40, %v853_v35  ;;  %v881_v24 = vmul.f32 %v872_v40, %v857_v41 }
 0x539   :  { %v1111_v2 = vpop.eup %1110 }
 0x53a   :  { %v851_v6 = vmul.f32 %v1111_v2, %v835_v45  ;;  %v855_v50 = vmul.f32 %v1111_v2, %v839_v48  ;;  %v901_v51 = vadd.f32 %v896_v49, %v877_v20  ;;  %v905_v46 = vadd.f32 %v896_v49, %v881_v24 }
 0x53c   :  { %v875_v13 = vmul.f32 %v1554_v42, %v851_v6  ;;  %v879_v17 = vmul.f32 %v1554_v42, %v855_v50  ;;  %909 = vst.msk [vmem:[#allocation2 + $0x18] sm:$0xff] %vm277_vm1, %v901_v51  ;;  %913 = vst.msk [vmem:[#allocation2 + $0x38] sm:$0xff] %vm277_vm1, %v905_v46 }
 0x53e   :  { %v899_v5 = vadd.f32 %v888_v15, %v875_v13  ;;  %v903_v10 = vadd.f32 %v888_v15, %v879_v17 }
 0x540   :  { %907 = vst.msk [vmem:[#allocation2 + $0x8] sm:$0xff] %vm277_vm1, %v899_v5  ;;  %911 = vst.msk [vmem:[#allocation2 + $0x28] sm:$0xff] %vm277_vm1, %v903_v10 }
 0x541   :  { %1123 = shalt.err (!%p1120_p4)
}
 0x542   :  { %s1141_s23 = smov 128   ;;  %s1142_s24 = smov 8  }
 0x543   :  { %925 = dma.vmem_to_hbm [thread:$0]  %s920_s21, 1024, %s1583_s6, [#allocation3], %s1141_s23, %s1141_s23, %s1142_s24  }
 0x544   :  { %1132 = dma.done.wait [#allocation3], 1024  }
 0x545   :  { %1133 = vsyncadd [#allocation3], 4294966272 }
 0x546   :  { %929 = vsyncpa [#allocation3], 1 }

</bundles_post_ra>
